<compile_context>
chip_gen: v6e
topology: v6e:2x2x1
jax: 0.10.0
libtpu: 0.0.40
codegen_flags: <defaults>
</compile_context>

<pallas_src>
import functools

import jax
import jax.numpy as jnp
from jax.experimental import pallas as pl
from jax.experimental.pallas import tpu as pltpu


def _round_up(n, m):
    return ((n + m - 1) // m) * m


def _recsys_mlp_kernel(x_ref, w1_ref, b1_ref, w2_ref, b2_ref, w3_ref, b3_ref, o_ref):
    """Fused 3-layer MLP + sigmoid. One batch tile per grid step; weights resident in VMEM.

    Matmuls run bf16 x bf16 on the MXU with f32 accumulation; bias add, ReLU and
    sigmoid are computed in f32 (works on v5e's f32-only VPU/EUP as well).
    """
    # Cast the streamed activations in-kernel (VPU op, free vs. a separate XLA cast op).
    x = x_ref[...].astype(jnp.bfloat16)

    # Layer 1: Linear(input_size -> hidden) + ReLU   (Dropout = identity in eval mode)
    h1 = jnp.dot(x, w1_ref[...], preferred_element_type=jnp.float32) + b1_ref[...]
    h1 = jnp.maximum(h1, 0.0).astype(jnp.bfloat16)

    # Layer 2: Linear(hidden -> hidden // 2) + ReLU  (Dropout = identity in eval mode)
    h2 = jnp.dot(h1, w2_ref[...], preferred_element_type=jnp.float32) + b2_ref[...]
    h2 = jnp.maximum(h2, 0.0).astype(jnp.bfloat16)

    # Layer 3: Linear(hidden // 2 -> num_actions) + sigmoid
    logits = jnp.dot(h2, w3_ref[...], preferred_element_type=jnp.float32) + b3_ref[...]
    o_ref[...] = jax.nn.sigmoid(logits).astype(o_ref.dtype)


def pack_params(params):
    """One-time packing: bf16 weights (MXU feed), f32 biases. Do NOT call per-forward."""
    return {
        "w1": params["w1"].astype(jnp.bfloat16),
        "b1": params["b1"].astype(jnp.float32),
        "w2": params["w2"].astype(jnp.bfloat16),
        "b2": params["b2"].astype(jnp.float32),
        "w3": params["w3"].astype(jnp.bfloat16),
        "b3": params["b3"].astype(jnp.float32),
    }


@functools.partial(jax.jit, static_argnames=("batch_tile", "out_dtype"))
def recommendation_generator_forward(x, packed, *, batch_tile=512, out_dtype=jnp.float32):
    """Fused MLP forward. `packed` must come from pack_params (bf16 weights, f32 biases).

    batch_tile guidance: 512-1024 on single-TC v5e/v6e (amortizes ~0.35us/step overhead);
    on v7x pick it so B/batch_tile is a multiple of 2 (>=2 steps per TensorCore) so
    BlockSpec pipelining hides the x load / output store on each core.
    """
    w1, b1, w2, b2, w3, b3 = (
        packed["w1"], packed["b1"], packed["w2"], packed["b2"], packed["w3"], packed["b3"]
    )
    B, D_in = x.shape
    H = w1.shape[1]
    H2 = w2.shape[1]
    A = w3.shape[1]

    # Batch tile: multiple of 8; pad batch only if it doesn't divide evenly.
    bt = _round_up(min(batch_tile, _round_up(B, 8)), 8)
    B_pad = _round_up(B, bt)
    if B_pad != B:
        x = jnp.pad(x, ((0, B_pad - B), (0, 0)))

    grid = (B_pad // bt,)

    # Weights/biases are whole-array blocks with a constant block index (resident in VMEM).
    # TODO(synk): if hidden_size is ever scaled up (H >= 4k), add pipeline_mode=pl.Buffered(1)
    # to these specs and set vmem_limit_bytes for v7x's 64 MiB physical VMEM.
    full = lambda shape: pl.BlockSpec(shape, lambda i: (0, 0))

    out = pl.pallas_call(
        _recsys_mlp_kernel,
        out_shape=jax.ShapeDtypeStruct((B_pad, A), out_dtype),
        grid_spec=pltpu.PrefetchScalarGridSpec(
            num_scalar_prefetch=0,
            grid=grid,
            in_specs=[
                pl.BlockSpec((bt, D_in), lambda i: (i, 0)),  # x (streamed per batch tile, f32)
                full((D_in, H)),   # w1 (bf16)
                full((1, H)),      # b1 (f32)
                full((H, H2)),     # w2 (bf16)
                full((1, H2)),     # b2 (f32)
                full((H2, A)),     # w3 (bf16)
                full((1, A)),      # b3 (f32)
            ],
            # (bt, A) is legal: A equals the full output dim; ~A masked-lane stores per row
            # beat writing a 128-lane padded buffer + a separate slice kernel.
            out_specs=pl.BlockSpec((bt, A), lambda i: (i, 0)),
        ),
        compiler_params=pltpu.CompilerParams(
            dimension_semantics=("parallel",),  # batch tiles shard across TCs (v7x megacore)
        ),
    )(x, w1, b1, w2, b2, w3, b3)

    if B_pad != B:
        out = out[:B]
    return out


def init_params(key, input_size, hidden_size, num_actions):
    """Deterministic f32 parameter init matching nn.Linear shapes (stored transposed)."""
    ks = jax.random.split(key, 6)

    def linear(kw, kb, fan_in, fan_out):
        bound = 1.0 / jnp.sqrt(fan_in)
        w = jax.random.uniform(kw, (fan_in, fan_out), jnp.float32, -bound, bound)
        b = jax.random.uniform(kb, (1, fan_out), jnp.float32, -bound, bound)
        return w, b

    w1, b1 = linear(ks[0], ks[1], input_size, hidden_size)
    w2, b2 = linear(ks[2], ks[3], hidden_size, hidden_size // 2)
    w3, b3 = linear(ks[4], ks[5], hidden_size // 2, num_actions)
    return {"w1": w1, "b1": b1, "w2": w2, "b2": b2, "w3": w3, "b3": b3}


if __name__ == "__main__":
    # Module defaults: hidden_size=128 (-> hidden//2=64), num_actions=10.
    # batch=256 with batch_tile=128 -> grid=2 (one tile per TC on v7x, pipelined on v5e/v6e).
    batch, input_size, hidden_size, num_actions = 256, 32, 128, 10

    key = jax.random.PRNGKey(0)
    k_x, k_p = jax.random.split(key)
    x = jax.random.normal(k_x, (batch, input_size), jnp.float32)
    params = init_params(k_p, input_size, hidden_size, num_actions)
    packed = pack_params(params)  # one-time: bf16 weights, f32 biases

    out = recommendation_generator_forward(x, packed, batch_tile=128)
    out = jax.block_until_ready(out)
    assert out.shape == (batch, num_actions)

    # Reference in plain JAX (eval-mode dropout == identity), same bf16 MXU feed.
    # NOTE: bf16 weights/activations differ from f32 PyTorch by more than this tolerance
    # would suggest against an f32 reference; keep params in f32 if exact parity is needed.
    xb = x.astype(jnp.bfloat16)
    h1 = jnp.maximum(
        jnp.dot(xb, packed["w1"], preferred_element_type=jnp.float32) + packed["b1"], 0.0)
    h2 = jnp.maximum(
        jnp.dot(h1.astype(jnp.bfloat16), packed["w2"], preferred_element_type=jnp.float32)
        + packed["b2"], 0.0)
    ref = jax.nn.sigmoid(
        jnp.dot(h2.astype(jnp.bfloat16), packed["w3"], preferred_element_type=jnp.float32)
        + packed["b3"])

    err = float(jnp.max(jnp.abs(out - ref)))
    assert err < 5e-3, f"max abs err {err}"

    print("KERNEL_OK")
</pallas_src>

<mosaic_0001>
module attributes {stable_mosaic.version = 11 : i64} {
  func.func @_recsys_mlp_kernel(%arg0: i32, %arg1: memref<128x32xf32, #tpu.memory_space<vmem>>, %arg2: memref<32x128xbf16, #tpu.memory_space<vmem>>, %arg3: memref<1x128xf32, #tpu.memory_space<vmem>>, %arg4: memref<128x64xbf16, #tpu.memory_space<vmem>>, %arg5: memref<1x64xf32, #tpu.memory_space<vmem>>, %arg6: memref<64x10xbf16, #tpu.memory_space<vmem>>, %arg7: memref<1x10xf32, #tpu.memory_space<vmem>>, %arg8: memref<128x10xf32, #tpu.memory_space<vmem>>) attributes {dimension_semantics = [#tpu.dimension_semantics<parallel>], iteration_bounds = array<i64: 2>, scalar_prefetch = 0 : i64, scratch_operands = 0 : i64, tpu.core_type = #tpu.core_type<tc>, window_params = [{transform_indices = @transform_0, window_bounds = array<i64: 128, 32>}, {pipeline_mode = #tpu.pipeline_mode<synchronous>, transform_indices = @transform_1, window_bounds = array<i64: 32, 128>}, {pipeline_mode = #tpu.pipeline_mode<synchronous>, transform_indices = @transform_2, window_bounds = array<i64: 1, 128>}, {pipeline_mode = #tpu.pipeline_mode<synchronous>, transform_indices = @transform_3, window_bounds = array<i64: 128, 64>}, {pipeline_mode = #tpu.pipeline_mode<synchronous>, transform_indices = @transform_4, window_bounds = array<i64: 1, 64>}, {pipeline_mode = #tpu.pipeline_mode<synchronous>, transform_indices = @transform_5, window_bounds = array<i64: 64, 10>}, {pipeline_mode = #tpu.pipeline_mode<synchronous>, transform_indices = @transform_6, window_bounds = array<i64: 1, 10>}, {transform_indices = @transform_7, window_bounds = array<i64: 128, 10>}]} {
    %c0 = arith.constant 0 : index
    %c0_0 = arith.constant 0 : index
    %0 = vector.load %arg1[%c0, %c0_0] : memref<128x32xf32, #tpu.memory_space<vmem>>, vector<128x32xf32>
    %1 = arith.truncf %0 : vector<128x32xf32> to vector<128x32xbf16>
    %c0_1 = arith.constant 0 : index
    %c0_2 = arith.constant 0 : index
    %2 = vector.load %arg2[%c0_1, %c0_2] : memref<32x128xbf16, #tpu.memory_space<vmem>>, vector<32x128xbf16>
    %cst = arith.constant dense<0.000000e+00> : vector<128x128xf32>
    %3 = tpu.matmul %1, %2, %cst {dimension_numbers = #tpu.dot_dimension_numbers<[1], [0], [0], [1], [0, 0, 1, 1], [], []>} : vector<128x32xbf16>, vector<32x128xbf16>, vector<128x128xf32> -> vector<128x128xf32>
    %c0_3 = arith.constant 0 : index
    %c0_4 = arith.constant 0 : index
    %4 = vector.load %arg3[%c0_3, %c0_4] : memref<1x128xf32, #tpu.memory_space<vmem>>, vector<1x128xf32>
    %5 = vector.broadcast %4 : vector<1x128xf32> to vector<128x128xf32>
    %6 = arith.addf %3, %5 : vector<128x128xf32>
    %cst_5 = arith.constant 0.000000e+00 : f32
    %7 = vector.broadcast %cst_5 : f32 to vector<128x128xf32>
    %8 = arith.maximumf %6, %7 : vector<128x128xf32>
    %9 = arith.truncf %8 : vector<128x128xf32> to vector<128x128xbf16>
    %c0_6 = arith.constant 0 : index
    %c0_7 = arith.constant 0 : index
    %10 = vector.load %arg4[%c0_6, %c0_7] : memref<128x64xbf16, #tpu.memory_space<vmem>>, vector<128x64xbf16>
    %cst_8 = arith.constant dense<0.000000e+00> : vector<128x64xf32>
    %11 = tpu.matmul %9, %10, %cst_8 {dimension_numbers = #tpu.dot_dimension_numbers<[1], [0], [0], [1], [0, 0, 1, 1], [], []>} : vector<128x128xbf16>, vector<128x64xbf16>, vector<128x64xf32> -> vector<128x64xf32>
    %c0_9 = arith.constant 0 : index
    %c0_10 = arith.constant 0 : index
    %12 = vector.load %arg5[%c0_9, %c0_10] : memref<1x64xf32, #tpu.memory_space<vmem>>, vector<1x64xf32>
    %13 = vector.broadcast %12 : vector<1x64xf32> to vector<128x64xf32>
    %14 = arith.addf %11, %13 : vector<128x64xf32>
    %cst_11 = arith.constant 0.000000e+00 : f32
    %15 = vector.broadcast %cst_11 : f32 to vector<128x64xf32>
    %16 = arith.maximumf %14, %15 : vector<128x64xf32>
    %17 = arith.truncf %16 : vector<128x64xf32> to vector<128x64xbf16>
    %c0_12 = arith.constant 0 : index
    %c0_13 = arith.constant 0 : index
    %18 = vector.load %arg6[%c0_12, %c0_13] : memref<64x10xbf16, #tpu.memory_space<vmem>>, vector<64x10xbf16>
    %cst_14 = arith.constant dense<0.000000e+00> : vector<128x10xf32>
    %19 = tpu.matmul %17, %18, %cst_14 {dimension_numbers = #tpu.dot_dimension_numbers<[1], [0], [0], [1], [0, 0, 1, 1], [], []>} : vector<128x64xbf16>, vector<64x10xbf16>, vector<128x10xf32> -> vector<128x10xf32>
    %c0_15 = arith.constant 0 : index
    %c0_16 = arith.constant 0 : index
    %20 = vector.load %arg7[%c0_15, %c0_16] : memref<1x10xf32, #tpu.memory_space<vmem>>, vector<1x10xf32>
    %21 = vector.broadcast %20 : vector<1x10xf32> to vector<128x10xf32>
    %22 = arith.addf %19, %21 : vector<128x10xf32>
    %23 = arith.negf %22 : vector<128x10xf32>
    %24 = math.exp %23 : vector<128x10xf32>
    %cst_17 = arith.constant 1.000000e+00 : f32
    %25 = vector.broadcast %cst_17 : f32 to vector<128x10xf32>
    %26 = arith.addf %25, %24 : vector<128x10xf32>
    %27 = arith.divf %25, %26 : vector<128x10xf32>
    %c0_18 = arith.constant 0 : index
    %c0_19 = arith.constant 0 : index
    %28 = vector.load %arg8[%c0_18, %c0_19] : memref<128x10xf32, #tpu.memory_space<vmem>>, vector<128x10xf32>
    tpu.vector_store %arg8[%c0_18, %c0_19], %27 {strides = array<i32>} : memref<128x10xf32, #tpu.memory_space<vmem>>, vector<128x10xf32>,
    return
  }
  func.func @transform_0(%arg0: i32) -> (i32, i32) {
    %c0_i32 = arith.constant 0 : i32
    %c0_i32_0 = arith.constant 0 : i32
    return %arg0, %c0_i32 : i32, i32
  }
  func.func @transform_1(%arg0: i32) -> (i32, i32) {
    %c0_i32 = arith.constant 0 : i32
    %c0_i32_0 = arith.constant 0 : i32
    %c0_i32_1 = arith.constant 0 : i32
    return %c0_i32, %c0_i32_0 : i32, i32
  }
  func.func @transform_2(%arg0: i32) -> (i32, i32) {
    %c0_i32 = arith.constant 0 : i32
    %c0_i32_0 = arith.constant 0 : i32
    %c0_i32_1 = arith.constant 0 : i32
    return %c0_i32, %c0_i32_0 : i32, i32
  }
  func.func @transform_3(%arg0: i32) -> (i32, i32) {
    %c0_i32 = arith.constant 0 : i32
    %c0_i32_0 = arith.constant 0 : i32
    %c0_i32_1 = arith.constant 0 : i32
    return %c0_i32, %c0_i32_0 : i32, i32
  }
  func.func @transform_4(%arg0: i32) -> (i32, i32) {
    %c0_i32 = arith.constant 0 : i32
    %c0_i32_0 = arith.constant 0 : i32
    %c0_i32_1 = arith.constant 0 : i32
    return %c0_i32, %c0_i32_0 : i32, i32
  }
  func.func @transform_5(%arg0: i32) -> (i32, i32) {
    %c0_i32 = arith.constant 0 : i32
    %c0_i32_0 = arith.constant 0 : i32
    %c0_i32_1 = arith.constant 0 : i32
    return %c0_i32, %c0_i32_0 : i32, i32
  }
  func.func @transform_6(%arg0: i32) -> (i32, i32) {
    %c0_i32 = arith.constant 0 : i32
    %c0_i32_0 = arith.constant 0 : i32
    %c0_i32_1 = arith.constant 0 : i32
    return %c0_i32, %c0_i32_0 : i32, i32
  }
  func.func @transform_7(%arg0: i32) -> (i32, i32) {
    %c0_i32 = arith.constant 0 : i32
    %c0_i32_0 = arith.constant 0 : i32
    return %arg0, %c0_i32 : i32, i32
  }
}

</mosaic_0001>

<bundles_post_ra>
// kernel: recommendation_generator_forward.1
= control target key start
LH: loop header
LB: loop body
LE: loop exit
PB: predicated region body
PF: predicated region fallthrough
CT: control target
= control target key end

     0   :  { %s1306_s24 = smov 0   ;;  %s1467_s0 = inlined_call_operand.vmem [shape: f32[256,32], index: 0, kind: input, shape index: {}]   ;;  %s1468_s1 = inlined_call_operand.vmem [shape: bf16[32,128], index: 1, kind: input, shape index: {}]   ;;  %s1469_s2 = inlined_call_operand.vmem [shape: f32[1,128], index: 2, kind: input, shape index: {}]   ;;  %s1470_s3 = inlined_call_operand.vmem [shape: bf16[128,64], index: 3, kind: input, shape index: {}]   ;;  %s1471_s4 = inlined_call_operand.vmem [shape: f32[1,64], index: 4, kind: input, shape index: {}]   ;;  %s1472_s5 = inlined_call_operand.vmem [shape: bf16[64,10], index: 5, kind: input, shape index: {}]   ;;  %s1473_s6 = inlined_call_operand.vmem [shape: f32[1,10], index: 6, kind: input, shape index: {}]   ;;  %s1474_s7 = inlined_call_operand.vmem [shape: f32[256,10], index: 7, kind: output, shape index: {}]  }
   0x1 LB: > { %s998_s25 = sadd.s32 4294967295, %s1264_s24   ;;  %p1002_p0 = scmp.ge.s32.totalorder %s1264_s24, 1  ;;  %s1264_s24 = sphi %s1306_s24, %s17_s24  }
   0x2   : > { %p238_p1 = scmp.lt.s32.totalorder %s1264_s24, 3 }
   0x4   : > { %p239_p2 = pnand %p1002_p0, %p238_p1 }
   0x5   : > { %s1003_s28 = sshll.u32 (!%p239_p2), %s998_s25, 4 }
   0x6   : > { %242 = sbr.rel (%p239_p2) target bundleno = 691 (0x2b3), region = 48  ;;  %p271_p3 = scmp.lt.s32.totalorder (!%p239_p2), %s1003_s28, 31 }
   0xb   : > { %v1180_v0 = vld [vmem:[%s1468_s1 + $0x8] sm:$0xff]   ;;  %v1181_v1 = vld [vmem:[%s1468_s1] sm:$0xff]   ;;  %v1182_v2 = vld [vmem:[%s1470_s3 + $0x38] sm:$0xff]   ;;  %s1476_s28 = smov (!%p271_p3, %s1003_s28), 31  ;;  %vm330_vm0 = vcmask 261120   ;;  %vm707_vm1 = vcmask 523264  }
   0xc   : > { %1096 = vmatprep.subr.bf16.mxu0 %v1180_v0  ;;  %v1183_v3 = vld [vmem:[%s1470_s3 + $0x30] sm:$0xff]   ;;  %1116 = vmatprep.subr.bf16.mxu1 %v1182_v2  ;;  %s1004_s12 = sshll.u32 %s1476_s28, 3  ;;  %v1184_v4 = vld [vmem:[%s1470_s3 + $0x28] sm:$0xff]   ;;  %v1185_v14 = vld [vmem:[%s1470_s3 + $0x20] sm:$0xff]   ;;  %vm925_vm2 = vcmask 80896  }
   0xd   : > { %1097 = vmatpush3.bf16.msra.mxu0 %v1180_v0  ;;  %1117 = vmatpush3.bf16.msra.mxu1 %v1182_v2  ;;  %s1334_s15 = scalar_lea.vmem %s1467_s0, %s1004_s12  ;;  %v1186_v19 = vld [vmem:[%s1470_s3 + $0x18] sm:$0xff]   ;;  %v1187_v31 = vld [vmem:[%s1470_s3 + $0x10] sm:$0xff]   ;;  %v1188_v32 = vld [vmem:[%s1470_s3 + $0x8] sm:$0xff]   ;;  %s1430_s25 = scalar_lea.vmem %s1474_s7, %s1004_s12 }
   0xe   : > { %1098 = vmatprep.subr.bf16.mxu0 %v1181_v1  ;;  %1118 = vmatprep.subr.bf16.mxu1 %v1183_v3  ;;  %v283_v5 = vld [vmem:[%s1334_s15] sm:$0xff]  ;;  %v284_v6 = vld [vmem:[%s1334_s15 + $0x8] sm:$0xff]  ;;  %v285_v7 = vld [vmem:[%s1334_s15 + $0x10] sm:$0xff] }
   0xf   : > { %v299_v8 = vpack.c.bf16 %v284_v6, %v283_v5  ;;  %v286_v9 = vld [vmem:[%s1334_s15 + $0x18] sm:$0xff]  ;;  %v287_v10 = vld [vmem:[%s1334_s15 + $0x20] sm:$0xff]  ;;  %v288_v11 = vld [vmem:[%s1334_s15 + $0x28] sm:$0xff] }
  0x10   : > { %v300_v12 = vpack.c.bf16 %v286_v9, %v285_v7  ;;  %v301_v13 = vpack.c.bf16 %v288_v11, %v287_v10  ;;  %v289_v15 = vld [vmem:[%s1334_s15 + $0x30] sm:$0xff]  ;;  %v290_v16 = vld [vmem:[%s1334_s15 + $0x38] sm:$0xff]  ;;  %v291_v17 = vld [vmem:[%s1334_s15 + $0x40] sm:$0xff] }
  0x11   : > { %1099 = vmatpush3.bf16.msra.mxu0 %v1181_v1  ;;  %1119 = vmatpush3.bf16.msra.mxu1 %v1183_v3  ;;  %v292_v18 = vld [vmem:[%s1334_s15 + $0x48] sm:$0xff]  ;;  %v302_v20 = vpack.c.bf16 %v290_v16, %v289_v15  ;;  %v293_v22 = vld [vmem:[%s1334_s15 + $0x50] sm:$0xff]  ;;  %v294_v23 = vld [vmem:[%s1334_s15 + $0x58] sm:$0xff] }
  0x12   : > { %1100 = vmatprep.mubr.msk.bf16.mxu0 %vm330_vm0, %v299_v8  ;;  %1120 = vmatprep.subr.bf16.mxu1 %v1184_v4  ;;  %v303_v21 = vpack.c.bf16 %v292_v18, %v291_v17  ;;  %v295_v24 = vld [vmem:[%s1334_s15 + $0x60] sm:$0xff]  ;;  %v296_v25 = vld [vmem:[%s1334_s15 + $0x68] sm:$0xff]  ;;  %v304_v26 = vpack.c.bf16 %v294_v23, %v293_v22  ;;  %v297_v28 = vld [vmem:[%s1334_s15 + $0x70] sm:$0xff] }
  0x13   : > { %v305_v27 = vpack.c.bf16 %v296_v25, %v295_v24  ;;  %v298_v29 = vld [vmem:[%s1334_s15 + $0x78] sm:$0xff]  ;;  %v1189_v33 = vld [vmem:[%s1470_s3] sm:$0xff]   ;;  %v1191_v35 = vld [vmem:[%s1472_s5 + $0x10] sm:$0xff]  }
  0x14   : > { %1101 = vmatmul.mubr.msk.bf16.vlgmr.msra.gmra.mxu0 %vm330_vm0, %v300_v12  ;;  %v306_v30 = vpack.c.bf16 %v298_v29, %v297_v28  ;;  %v1190_v34 = vld [vmem:[%s1472_s5 + $0x18] sm:$0xff]   ;;  %v1192_v36 = vld [vmem:[%s1472_s5 + $0x8] sm:$0xff]   ;;  %v1007_v39 = vld [vmem:[%s1469_s2] ss:$0 sm:$0xff] }
  0x15   : > { %1104 = vmatprep.mubr.msk.bf16.mxu0 %vm330_vm0, %v301_v13  ;;  %1121 = vmatpush3.bf16.msra.mxu1 %v1184_v4 }
  0x16   : > { %1122 = vmatprep.subr.bf16.mxu1 %v1185_v14  ;;  %1148 = vmatprep.subr.bf16.mxu0 %v1190_v34 }
  0x17   : > { %1149 = vmatpush3.bf16.msra.mxu0 %v1190_v34 }
  0x18   : > { %1150 = vmatprep.subr.bf16.mxu0 %v1191_v35 }
  0x19   : > { %1123 = vmatpush3.bf16.msra.mxu1 %v1185_v14 }
  0x1a   : > { %1124 = vmatprep.subr.bf16.mxu1 %v1186_v19 }
  0x1b   : > { %1151 = vmatpush3.bf16.msra.mxu0 %v1191_v35 }
  0x1c   : > { %1105 = vmatmul.mubr.msk.bf16.gmra.mxu0 %vm330_vm0, %v302_v20  ;;  %1152 = vmatprep.subr.bf16.mxu0 %v1192_v36 }
  0x1d   : > { %1108 = vmatprep.mubr.msk.bf16.mxu0 %vm330_vm0, %v303_v21  ;;  %1125 = vmatpush3.bf16.msra.mxu1 %v1186_v19 }
  0x1e   : > { %1126 = vmatprep.subr.bf16.mxu1 %v1187_v31 }
  0x1f   : > { %1153 = vmatpush3.bf16.msra.mxu0 %v1192_v36 }
  0x21   : > { %1127 = vmatpush3.bf16.msra.mxu1 %v1187_v31 }
  0x22   : > { %1128 = vmatprep.subr.bf16.mxu1 %v1188_v32 }
  0x24   : > { %1109 = vmatmul.mubr.msk.bf16.gmra.mxu0 %vm330_vm0, %v304_v26 }
  0x25   : > { %1112 = vmatprep.mubr.msk.bf16.mxu0 %vm330_vm0, %v305_v27  ;;  %1129 = vmatpush3.bf16.msra.mxu1 %v1188_v32 }
  0x26   : > { %1130 = vmatprep.subr.bf16.mxu1 %v1189_v33 }
  0x29   : > { %1131 = vmatpush3.bf16.msra.mxu1 %v1189_v33  ;;  %v1018_v33 = vld [vmem:[%s1471_s4] ss:$0 sm:$0xff] }
  0x2c   : > { %1113 = vmatmul.mubr.msk.bf16.gmra.mxu0 %vm330_vm0, %v306_v30  ;;  %v1193_v30 = vld [vmem:[%s1472_s5] sm:$0xff]  }
  0x2d   : > { %1154 = vmatprep.subr.bf16.mxu0 %v1193_v30 }
  0x2e   : > { %1155 = vmatpush3.bf16.msra.mxu0 %v1193_v30 }
  0xd4   : > { %v1102_v37 = vpop.f32.mrf.mxu0 }
  0xd5   : > { %v398_v43 = vadd.f32 %v1102_v37, %v1007_v39 }
  0xd6   : > { %v389_v38 = vpop.f32.mrf.mxu0 }
  0xd7   : > { %v390_v41 = vadd.f32 %v1007_v39, %v389_v38  ;;  %v454_v50 = vmax.f32 %v398_v43, 0.0 }
  0xd8   : > { %v1103_v40 = vpop.f32.mrf.mxu0 }
  0xd9   : > { %v401_v42 = vadd.f32 %v1103_v40, %v1007_v39  ;;  %v452_v48 = vmax.f32 %v390_v41, 0.0 }
  0xda   : > { %v392_v44 = vpop.f32.mrf.mxu0 }
  0xdb   : > { %v393_v45 = vadd.f32 %v1007_v39, %v392_v44  ;;  %v455_v46 = vmax.f32 %v401_v42, 0.0 }
  0xdc   : > { %v1106_v47 = vpop.f32.mrf.mxu0 }
  0xdd   : > { %v453_v49 = vmax.f32 %v393_v45, 0.0  ;;  %v469_v53 = vpack.c.bf16 %v455_v46, %v454_v50  ;;  %v414_v57 = vadd.f32 %v1106_v47, %v1007_v39 }
  0xde   : > { %v405_v51 = vpop.f32.mrf.mxu0 }
  0xdf   : > { %v468_v52 = vpack.c.bf16 %v453_v49, %v452_v48  ;;  %v406_v55 = vadd.f32 %v1007_v39, %v405_v51  ;;  %v458_v0 = vmax.f32 %v414_v57, 0.0 }
  0xe0   : > { %v1107_v54 = vpop.f32.mrf.mxu0 }
  0xe1   : > { %v417_v56 = vadd.f32 %v1107_v54, %v1007_v39  ;;  %1132 = vmatprep.mubr.bf16.mxu1 %v468_v52  ;;  %v456_v62 = vmax.f32 %v406_v55, 0.0 }
  0xe2   : > { %v408_v58 = vpop.f32.mrf.mxu0  ;;  %1133 = vmatmul.mubr.bf16.vlgmr.msra.gmra.mxu1 %v469_v53 }
  0xe3   : > { %v409_v59 = vadd.f32 %v1007_v39, %v408_v58  ;;  %v459_v60 = vmax.f32 %v417_v56, 0.0 }
  0xe4   : > { %v1110_v61 = vpop.f32.mrf.mxu0 }
  0xe5   : > { %v457_v63 = vmax.f32 %v409_v59, 0.0  ;;  %v471_v3 = vpack.c.bf16 %v459_v60, %v458_v0  ;;  %v430_v7 = vadd.f32 %v1110_v61, %v1007_v39 }
  0xe6   : > { %v421_v1 = vpop.f32.mrf.mxu0 }
  0xe7   : > { %v470_v2 = vpack.c.bf16 %v457_v63, %v456_v62  ;;  %v422_v5 = vadd.f32 %v1007_v39, %v421_v1  ;;  %v462_v14 = vmax.f32 %v430_v7, 0.0 }
  0xe8   : > { %v1111_v4 = vpop.f32.mrf.mxu0 }
  0xe9   : > { %v433_v6 = vadd.f32 %v1111_v4, %v1007_v39  ;;  %1136 = vmatprep.mubr.bf16.mxu1 %v470_v2  ;;  %v460_v12 = vmax.f32 %v422_v5, 0.0 }
  0xea   : > { %v424_v8 = vpop.f32.mrf.mxu0  ;;  %1137 = vmatmul.mubr.bf16.gmra.mxu1 %v471_v3 }
  0xeb   : > { %v425_v9 = vadd.f32 %v1007_v39, %v424_v8  ;;  %v463_v10 = vmax.f32 %v433_v6, 0.0 }
  0xec   : > { %v1114_v11 = vpop.f32.mrf.mxu0 }
  0xed   : > { %v461_v13 = vmax.f32 %v425_v9, 0.0  ;;  %v473_v17 = vpack.c.bf16 %v463_v10, %v462_v14  ;;  %v446_v21 = vadd.f32 %v1114_v11, %v1007_v39 }
  0xee   : > { %v437_v15 = vpop.f32.mrf.mxu0 }
  0xef   : > { %v472_v16 = vpack.c.bf16 %v461_v13, %v460_v12  ;;  %v438_v19 = vadd.f32 %v1007_v39, %v437_v15  ;;  %v466_v27 = vmax.f32 %v446_v21, 0.0 }
  0xf0   : > { %v1115_v18 = vpop.f32.mrf.mxu0 }
  0xf1   : > { %v449_v20 = vadd.f32 %v1115_v18, %v1007_v39  ;;  %1140 = vmatprep.mubr.bf16.mxu1 %v472_v16  ;;  %v464_v25 = vmax.f32 %v438_v19, 0.0 }
  0xf2   : > { %v440_v22 = vpop.f32.mrf.mxu0  ;;  %1141 = vmatmul.mubr.bf16.gmra.mxu1 %v473_v17 }
  0xf3   : > { %v441_v23 = vadd.f32 %v1007_v39, %v440_v22  ;;  %v467_v24 = vmax.f32 %v449_v20, 0.0 }
  0xf5   : > { %v465_v26 = vmax.f32 %v441_v23, 0.0  ;;  %v475_v29 = vpack.c.bf16 %v467_v24, %v466_v27  ;;  %v1407_v24 = vld [vmem:[%s1473_s6] ss:$0 sm:$0xff] }
  0xf7   : > { %v474_v28 = vpack.c.bf16 %v465_v26, %v464_v25 }
  0xf9   : > { %1144 = vmatprep.mubr.bf16.mxu1 %v474_v28 }
  0xfa   : > { %1145 = vmatmul.mubr.bf16.gmra.mxu1 %v475_v29 }
 0x1a2   : > { %v1134_v31 = vpop.f32.mrf.mxu1 }
 0x1a3   : > { %v590_v37 = vadd.f32 %v1134_v31, %v1018_v33 }
 0x1a4   : > { %v581_v32 = vpop.f32.mrf.mxu1 }
 0x1a5   : > { %v582_v35 = vadd.f32 %v1018_v33, %v581_v32  ;;  %v646_v44 = vmax.f32 %v590_v37, 0.0 }
 0x1a6   : > { %v1135_v34 = vpop.f32.mrf.mxu1 }
 0x1a7   : > { %v593_v36 = vadd.f32 %v1135_v34, %v1018_v33  ;;  %v644_v42 = vmax.f32 %v582_v35, 0.0 }
 0x1a8   : > { %v584_v38 = vpop.f32.mrf.mxu1 }
 0x1a9   : > { %v585_v39 = vadd.f32 %v1018_v33, %v584_v38  ;;  %v647_v40 = vmax.f32 %v593_v36, 0.0 }
 0x1aa   : > { %v1138_v41 = vpop.f32.mrf.mxu1 }
 0x1ab   : > { %v645_v43 = vmax.f32 %v585_v39, 0.0  ;;  %v661_v47 = vpack.c.bf16 %v647_v40, %v646_v44  ;;  %v606_v51 = vadd.f32 %v1138_v41, %v1018_v33 }
 0x1ac   : > { %v597_v45 = vpop.f32.mrf.mxu1 }
 0x1ad   : > { %v660_v46 = vpack.c.bf16 %v645_v43, %v644_v42  ;;  %v598_v49 = vadd.f32 %v1018_v33, %v597_v45  ;;  %v650_v58 = vmax.f32 %v606_v51, 0.0 }
 0x1ae   : > { %v1139_v48 = vpop.f32.mrf.mxu1 }
 0x1af   : > { %v609_v50 = vadd.f32 %v1139_v48, %v1018_v33  ;;  %1156 = vmatprep.mubr.msk.bf16.mxu0 %vm707_vm1, %v660_v46  ;;  %v648_v56 = vmax.f32 %v598_v49, 0.0 }
 0x1b0   : > { %v600_v52 = vpop.f32.mrf.mxu1  ;;  %1157 = vmatmul.mubr.msk.bf16.vlgmr.msra.gmra.mxu0 %vm707_vm1, %v661_v47 }
 0x1b1   : > { %v601_v53 = vadd.f32 %v1018_v33, %v600_v52  ;;  %v651_v54 = vmax.f32 %v609_v50, 0.0 }
 0x1b2   : > { %v1142_v55 = vpop.f32.mrf.mxu1 }
 0x1b3   : > { %v649_v57 = vmax.f32 %v601_v53, 0.0  ;;  %v663_v61 = vpack.c.bf16 %v651_v54, %v650_v58  ;;  %v622_v1 = vadd.f32 %v1142_v55, %v1018_v33 }
 0x1b4   : > { %v613_v59 = vpop.f32.mrf.mxu1 }
 0x1b5   : > { %v662_v60 = vpack.c.bf16 %v649_v57, %v648_v56  ;;  %v614_v63 = vadd.f32 %v1018_v33, %v613_v59  ;;  %v654_v8 = vmax.f32 %v622_v1, 0.0 }
 0x1b6   : > { %v1143_v62 = vpop.f32.mrf.mxu1 }
 0x1b7   : > { %v625_v0 = vadd.f32 %v1143_v62, %v1018_v33  ;;  %1160 = vmatprep.mubr.msk.bf16.mxu0 %vm707_vm1, %v662_v60  ;;  %v652_v6 = vmax.f32 %v614_v63, 0.0 }
 0x1b8   : > { %v616_v2 = vpop.f32.mrf.mxu1  ;;  %1161 = vmatmul.mubr.msk.bf16.gmra.mxu0 %vm707_vm1, %v663_v61 }
 0x1b9   : > { %v617_v3 = vadd.f32 %v1018_v33, %v616_v2  ;;  %v655_v4 = vmax.f32 %v625_v0, 0.0 }
 0x1ba   : > { %v1146_v5 = vpop.f32.mrf.mxu1 }
 0x1bb   : > { %v653_v7 = vmax.f32 %v617_v3, 0.0  ;;  %v665_v11 = vpack.c.bf16 %v655_v4, %v654_v8  ;;  %v638_v15 = vadd.f32 %v1146_v5, %v1018_v33 }
 0x1bc   : > { %v629_v9 = vpop.f32.mrf.mxu1 }
 0x1bd   : > { %v664_v10 = vpack.c.bf16 %v653_v7, %v652_v6  ;;  %v630_v13 = vadd.f32 %v1018_v33, %v629_v9  ;;  %v658_v21 = vmax.f32 %v638_v15, 0.0 }
 0x1be   : > { %v1147_v12 = vpop.f32.mrf.mxu1 }
 0x1bf   : > { %v641_v14 = vadd.f32 %v1147_v12, %v1018_v33  ;;  %1164 = vmatprep.mubr.msk.bf16.mxu0 %vm707_vm1, %v664_v10  ;;  %v656_v19 = vmax.f32 %v630_v13, 0.0 }
 0x1c0   : > { %v632_v16 = vpop.f32.mrf.mxu1  ;;  %1165 = vmatmul.mubr.msk.bf16.gmra.mxu0 %vm707_vm1, %v665_v11 }
 0x1c1   : > { %v633_v17 = vadd.f32 %v1018_v33, %v632_v16  ;;  %v659_v18 = vmax.f32 %v641_v14, 0.0 }
 0x1c3   : > { %v657_v20 = vmax.f32 %v633_v17, 0.0  ;;  %v667_v23 = vpack.c.bf16 %v659_v18, %v658_v21 }
 0x1c5   : > { %v666_v22 = vpack.c.bf16 %v657_v20, %v656_v19 }
 0x1c7   : > { %1168 = vmatprep.mubr.msk.bf16.mxu0 %vm707_vm1, %v666_v22 }
 0x1c8   : > { %1169 = vmatmul.mubr.msk.bf16.gmra.mxu0 %vm707_vm1, %v667_v23 }
 0x270   : > { %v1158_v25 = vpop.f32.mrf.mxu0 }
 0x271   : > { %v775_v26 = vadd.f32 %v1158_v25, %v1407_v24 }
 0x272   : > { %v766_v27 = vpop.f32.mrf.mxu0 }
 0x273   : > { %v1042_v28 = vmul.f32 -1.442695, %v775_v26  ;;  %v767_v29 = vadd.f32 %v1407_v24, %v766_v27 }
 0x274   : > { %v1159_v30 = vpop.f32.mrf.mxu0 }
 0x275   : > { %1194 = vpow2.f32 %v1042_v28  ;;  %v1040_v31 = vmul.f32 -1.442695, %v767_v29  ;;  %v778_v32 = vadd.f32 %v1159_v30, %v1407_v24 }
 0x276   : > { %v769_v33 = vpop.f32.mrf.mxu0 }
 0x277   : > { %1196 = vpow2.f32 %v1040_v31  ;;  %v1043_v34 = vmul.f32 -1.442695, %v778_v32  ;;  %v770_v35 = vadd.f32 %v1407_v24, %v769_v33 }
 0x278   : > { %v1162_v36 = vpop.f32.mrf.mxu0 }
 0x279   : > { %1198 = vpow2.f32 %v1043_v34  ;;  %v1041_v37 = vmul.f32 -1.442695, %v770_v35  ;;  %v791_v38 = vadd.f32 %v1162_v36, %v1407_v24 }
 0x27a   : > { %v782_v39 = vpop.f32.mrf.mxu0 }
 0x27b   : > { %1200 = vpow2.f32 %v1041_v37  ;;  %v1046_v40 = vmul.f32 -1.442695, %v791_v38  ;;  %v783_v41 = vadd.f32 %v1407_v24, %v782_v39 }
 0x27c   : > { %v1163_v42 = vpop.f32.mrf.mxu0 }
 0x27d   : > { %1202 = vpow2.f32 %v1046_v40  ;;  %v1044_v43 = vmul.f32 -1.442695, %v783_v41  ;;  %v794_v44 = vadd.f32 %v1163_v42, %v1407_v24 }
 0x27e   : > { %v785_v45 = vpop.f32.mrf.mxu0 }
 0x27f   : > { %1204 = vpow2.f32 %v1044_v43  ;;  %v1047_v46 = vmul.f32 -1.442695, %v794_v44  ;;  %v786_v47 = vadd.f32 %v1407_v24, %v785_v45 }
 0x280   : > { %v1166_v48 = vpop.f32.mrf.mxu0 }
 0x281   : > { %1206 = vpow2.f32 %v1047_v46  ;;  %v1045_v49 = vmul.f32 -1.442695, %v786_v47  ;;  %v807_v50 = vadd.f32 %v1166_v48, %v1407_v24 }
 0x282   : > { %v1195_v51 = vpop.eup %1194  ;;  %v798_v52 = vpop.f32.mrf.mxu0 }
 0x283   : > { %v879_v53 = vadd.f32 1.0, %v1195_v51  ;;  %1208 = vpow2.f32 %v1045_v49  ;;  %v1050_v54 = vmul.f32 -1.442695, %v807_v50  ;;  %v799_v55 = vadd.f32 %v1407_v24, %v798_v52 }
 0x284   : > { %v1197_v56 = vpop.eup %1196  ;;  %v1167_v57 = vpop.f32.mrf.mxu0 }
 0x285   : > { %1210 = vrcp.f32 %v879_v53  ;;  %v877_v58 = vadd.f32 1.0, %v1197_v56  ;;  %v1048_v59 = vmul.f32 -1.442695, %v799_v55  ;;  %v810_v60 = vadd.f32 %v1167_v57, %v1407_v24 }
 0x286   : > { %v1199_v61 = vpop.eup %1198  ;;  %1212 = vpow2.f32 %v1050_v54  ;;  %v801_v62 = vpop.f32.mrf.mxu0 }
 0x287   : > { %1214 = vrcp.f32 %v877_v58  ;;  %v880_v63 = vadd.f32 1.0, %v1199_v61  ;;  %v1051_v0 = vmul.f32 -1.442695, %v810_v60  ;;  %v802_v1 = vadd.f32 %v1407_v24, %v801_v62 }
 0x288   : > { %v1201_v2 = vpop.eup %1200  ;;  %1216 = vpow2.f32 %v1048_v59  ;;  %v1170_v3 = vpop.f32.mrf.mxu0 }
 0x289   : > { %1218 = vrcp.f32 %v880_v63  ;;  %v878_v4 = vadd.f32 1.0, %v1201_v2  ;;  %v1049_v5 = vmul.f32 -1.442695, %v802_v1  ;;  %v823_v6 = vadd.f32 %v1170_v3, %v1407_v24 }
 0x28a   : > { %v1203_v7 = vpop.eup %1202  ;;  %1220 = vpow2.f32 %v1051_v0  ;;  %v814_v8 = vpop.f32.mrf.mxu0 }
 0x28b   : > { %1222 = vrcp.f32 %v878_v4  ;;  %v883_v9 = vadd.f32 1.0, %v1203_v7  ;;  %v1054_v10 = vmul.f32 -1.442695, %v823_v6  ;;  %v815_v11 = vadd.f32 %v1407_v24, %v814_v8 }
 0x28c   : > { %v1205_v12 = vpop.eup %1204  ;;  %1224 = vpow2.f32 %v1049_v5  ;;  %v1171_v13 = vpop.f32.mrf.mxu0 }
 0x28d   : > { %1226 = vrcp.f32 %v883_v9  ;;  %v881_v14 = vadd.f32 1.0, %v1205_v12  ;;  %v1052_v15 = vmul.f32 -1.442695, %v815_v11  ;;  %v826_v16 = vadd.f32 %v1171_v13, %v1407_v24 }
 0x28e   : > { %v1207_v17 = vpop.eup %1206  ;;  %1228 = vpow2.f32 %v1054_v10  ;;  %v817_v18 = vpop.f32.mrf.mxu0 }
 0x28f   : > { %1230 = vrcp.f32 %v881_v14  ;;  %v884_v19 = vadd.f32 1.0, %v1207_v17  ;;  %v1055_v20 = vmul.f32 -1.442695, %v826_v16  ;;  %v818_v21 = vadd.f32 %v1407_v24, %v817_v18 }
 0x290   : > { %v1209_v22 = vpop.eup %1208  ;;  %1232 = vpow2.f32 %v1052_v15 }
 0x291   : > { %1234 = vrcp.f32 %v884_v19  ;;  %v882_v23 = vadd.f32 1.0, %v1209_v22  ;;  %v1053_v25 = vmul.f32 -1.442695, %v818_v21 }
 0x292   : > { %v1211_v26 = vpop.eup %1210  ;;  %1236 = vpow2.f32 %v1055_v20 }
 0x293   : > { %v1213_v27 = vpop.eup %1212  ;;  %928 = vst.msk [vmem:[%s1430_s25 + $0x10] sm:$0xff] %vm925_vm2, %v1211_v26  ;;  %1238 = vrcp.f32 %v882_v23 }
 0x294   : > { %v1215_v24 = vpop.eup %1214  ;;  %v887_v28 = vadd.f32 1.0, %v1213_v27  ;;  %1240 = vpow2.f32 %v1053_v25 }
 0x295   : > { %v1217_v29 = vpop.eup %1216  ;;  %926 = vst.msk [vmem:[%s1430_s25] sm:$0xff] %vm925_vm2, %v1215_v24 }
 0x296   : > { %v1219_v30 = vpop.eup %1218  ;;  %1242 = vrcp.f32 %v887_v28  ;;  %v885_v31 = vadd.f32 1.0, %v1217_v29 }
 0x297   : > { %v1221_v32 = vpop.eup %1220  ;;  %929 = vst.msk [vmem:[%s1430_s25 + $0x18] sm:$0xff] %vm925_vm2, %v1219_v30 }
 0x298   : > { %v1223_v33 = vpop.eup %1222  ;;  %1244 = vrcp.f32 %v885_v31  ;;  %v888_v34 = vadd.f32 1.0, %v1221_v32 }
 0x299   : > { %v1225_v35 = vpop.eup %1224  ;;  %927 = vst.msk [vmem:[%s1430_s25 + $0x8] sm:$0xff] %vm925_vm2, %v1223_v33 }
 0x29a   : > { %v1227_v36 = vpop.eup %1226  ;;  %1246 = vrcp.f32 %v888_v34  ;;  %v886_v37 = vadd.f32 1.0, %v1225_v35 }
 0x29b   : > { %v1229_v38 = vpop.eup %1228  ;;  %932 = vst.msk [vmem:[%s1430_s25 + $0x30] sm:$0xff] %vm925_vm2, %v1227_v36 }
 0x29c   : > { %v1231_v39 = vpop.eup %1230  ;;  %1248 = vrcp.f32 %v886_v37  ;;  %v891_v40 = vadd.f32 1.0, %v1229_v38 }
 0x29d   : > { %v1233_v41 = vpop.eup %1232  ;;  %930 = vst.msk [vmem:[%s1430_s25 + $0x20] sm:$0xff] %vm925_vm2, %v1231_v39 }
 0x29e   : > { %v1235_v42 = vpop.eup %1234  ;;  %1250 = vrcp.f32 %v891_v40  ;;  %v889_v43 = vadd.f32 1.0, %v1233_v41 }
 0x29f   : > { %v1237_v44 = vpop.eup %1236  ;;  %933 = vst.msk [vmem:[%s1430_s25 + $0x38] sm:$0xff] %vm925_vm2, %v1235_v42 }
 0x2a0   : > { %v1239_v45 = vpop.eup %1238  ;;  %1252 = vrcp.f32 %v889_v43  ;;  %v892_v46 = vadd.f32 1.0, %v1237_v44 }
 0x2a1   : > { %v1241_v47 = vpop.eup %1240  ;;  %931 = vst.msk [vmem:[%s1430_s25 + $0x28] sm:$0xff] %vm925_vm2, %v1239_v45 }
 0x2a2   : > { %1254 = vrcp.f32 %v892_v46  ;;  %v890_v48 = vadd.f32 1.0, %v1241_v47 }
 0x2a3   : > { %v1243_v49 = vpop.eup %1242 }
 0x2a4   : > { %936 = vst.msk [vmem:[%s1430_s25 + $0x50] sm:$0xff] %vm925_vm2, %v1243_v49  ;;  %1256 = vrcp.f32 %v890_v48 }
 0x2a5   : > { %v1245_v50 = vpop.eup %1244 }
 0x2a6   : > { %934 = vst.msk [vmem:[%s1430_s25 + $0x40] sm:$0xff] %vm925_vm2, %v1245_v50 }
 0x2a7   : > { %v1247_v51 = vpop.eup %1246 }
 0x2a8   : > { %937 = vst.msk [vmem:[%s1430_s25 + $0x58] sm:$0xff] %vm925_vm2, %v1247_v51 }
 0x2a9   : > { %v1249_v52 = vpop.eup %1248 }
 0x2aa   : > { %935 = vst.msk [vmem:[%s1430_s25 + $0x48] sm:$0xff] %vm925_vm2, %v1249_v52 }
 0x2ab   : > { %v1251_v53 = vpop.eup %1250 }
 0x2ac   : > { %940 = vst.msk [vmem:[%s1430_s25 + $0x70] sm:$0xff] %vm925_vm2, %v1251_v53 }
 0x2ad   : > { %v1253_v54 = vpop.eup %1252 }
 0x2ae   : > { %938 = vst.msk [vmem:[%s1430_s25 + $0x60] sm:$0xff] %vm925_vm2, %v1253_v54 }
 0x2af   : > { %v1255_v55 = vpop.eup %1254 }
 0x2b0   : > { %941 = vst.msk [vmem:[%s1430_s25 + $0x78] sm:$0xff] %vm925_vm2, %v1255_v55 }
 0x2b1   : > { %v1257_v56 = vpop.eup %1256 }
 0x2b2   : > { %939 = vst.msk [vmem:[%s1430_s25 + $0x68] sm:$0xff] %vm925_vm2, %v1257_v56 }
 0x2b3 PF: > { %s17_s24 = sadd.s32 1, %s1264_s24  }
 0x2b4   : > { %p14_p4 = scmp.ge.s32.totalorder %s17_s24, 4  }
 0x2b6   :  { %16 = sbr.rel (!%p14_p4) target bundleno = 1 (0x1), region = 78 }

</bundles_post_ra>
